<compile_context>
chip_gen: v7x
topology: tpu7x:2x2x1
jax: 0.10.0
libtpu: 0.0.40
codegen_flags: <defaults>
</compile_context>

<pallas_src>
import functools

import jax
import jax.numpy as jnp
from jax.experimental import pallas as pl
from jax.experimental.pallas import tpu as pltpu

H1, H2 = 400, 300          # logical hidden sizes from the PyTorch module
H1_PAD, H2_PAD = 512, 384  # lane-padded (multiples of 128) storage sizes
LANES = 128


def _round_up(x, m):
    return ((x + m - 1) // m) * m


def _pick_batch_tile(B):
    """Batch tile: big enough to amortize per-grid-step overhead, small enough
    for v5e's 16 MiB default scoped VMEM, and >=4 tiles when B is large so
    v7x's two TensorCores both get work."""
    if B <= 1024:
        return B                      # single full-batch tile (block == full dim)
    tb = max(512, pl.cdiv(B, 4))      # >=512 rows/tile, ~4+ grid steps
    tb = min(((tb + 7) // 8) * 8, 1024)
    return tb


def _mlp_kernel(x_ref, w1_ref, b1_ref, w2_ref, b2_ref, w3_ref, b3_ref, o_ref):
    # bf16 MXU path with f32 accumulation; elementwise epilogues stay f32.
    x = x_ref[...].astype(jnp.bfloat16)

    # Layer 1: Linear(obs_size -> 512-padded 400) + ReLU  (padded lanes stay 0)
    h1 = jnp.dot(x, w1_ref[...], preferred_element_type=jnp.float32) + b1_ref[...]
    h1 = jnp.maximum(h1, 0.0)

    # Layer 2: Linear(512 -> 384-padded 300) + ReLU
    h2 = jnp.dot(h1.astype(jnp.bfloat16), w2_ref[...],
                 preferred_element_type=jnp.float32) + b2_ref[...]
    h2 = jnp.maximum(h2, 0.0)

    # Layer 3: Linear(384 -> 128-padded act_size) + Tanh (lane-dense store)
    h3 = jnp.dot(h2.astype(jnp.bfloat16), w3_ref[...],
                 preferred_element_type=jnp.float32) + b3_ref[...]
    o_ref[...] = jnp.tanh(h3).astype(o_ref.dtype)


@functools.partial(jax.jit, static_argnames=("act_size",))
def actor_policy_forward(obs, params, *, act_size):
    """obs: (B, obs_size) f32; params: dict of lane-padded (in,out) weights."""
    w1, b1 = params["w1"], params["b1"]
    w2, b2 = params["w2"], params["b2"]
    w3, b3 = params["w3"], params["b3"]

    B, obs_size = obs.shape
    act_pad = w3.shape[1]

    TB = _pick_batch_tile(B)
    grid = (pl.cdiv(B, TB),)

    # Weights/biases: whole-array blocks with a constant index_map, so they are
    # DMA'd once and stay VMEM-resident across every batch tile.
    resident = lambda arr: pl.BlockSpec(arr.shape, lambda i: (0, 0))

    out_pad = pl.pallas_call(
        _mlp_kernel,
        out_shape=jax.ShapeDtypeStruct((B, act_pad), jnp.float32),
        grid=grid,
        in_specs=[
            pl.BlockSpec((TB, obs_size), lambda i: (i, 0)),
            resident(w1), resident(b1),
            resident(w2), resident(b2),
            resident(w3), resident(b3),
        ],
        out_specs=pl.BlockSpec((TB, act_pad), lambda i: (i, 0)),
        compiler_params=pltpu.CompilerParams(
            dimension_semantics=("parallel",),  # shard batch tiles across TCs (v7x)
        ),
    )(obs, w1, b1, w2, b2, w3, b3)

    # Drop the lane padding; padded columns are exactly tanh(0) = 0.
    return out_pad[:, :act_size]


def init_params(key, obs_size, act_size):
    """PyTorch-default-style Linear init, stored pre-transposed as (in, out),
    zero-padded to lane-dense shapes. Weights bf16, biases f32."""
    ks = jax.random.split(key, 6)
    act_pad = _round_up(act_size, LANES)

    def unif(k, shape, fan_in, dtype):
        bound = 1.0 / (fan_in ** 0.5)
        return jax.random.uniform(k, shape, jnp.float32, -bound, bound).astype(dtype)

    w1 = jnp.zeros((obs_size, H1_PAD), jnp.bfloat16).at[:, :H1].set(
        unif(ks[0], (obs_size, H1), obs_size, jnp.bfloat16))
    b1 = jnp.zeros((1, H1_PAD), jnp.float32).at[:, :H1].set(
        unif(ks[1], (1, H1), obs_size, jnp.float32))
    w2 = jnp.zeros((H1_PAD, H2_PAD), jnp.bfloat16).at[:H1, :H2].set(
        unif(ks[2], (H1, H2), H1, jnp.bfloat16))
    b2 = jnp.zeros((1, H2_PAD), jnp.float32).at[:, :H2].set(
        unif(ks[3], (1, H2), H1, jnp.float32))
    w3 = jnp.zeros((H2_PAD, act_pad), jnp.bfloat16).at[:H2, :act_size].set(
        unif(ks[4], (H2, act_size), H2, jnp.bfloat16))
    b3 = jnp.zeros((1, act_pad), jnp.float32).at[:, :act_size].set(
        unif(ks[5], (1, act_size), H2, jnp.float32))

    return {"w1": w1, "b1": b1, "w2": w2, "b2": b2, "w3": w3, "b3": b3}


def reference_forward(obs, params, act_size):
    """Pure-JAX reference on the UNPADDED logical weights (validates that the
    zero-padding in the kernel is exact), same bf16/f32-acc recipe."""
    w1, b1 = params["w1"][:, :H1], params["b1"][:, :H1]
    w2, b2 = params["w2"][:H1, :H2], params["b2"][:, :H2]
    w3, b3 = params["w3"][:H2, :act_size], params["b3"][:, :act_size]

    h1 = jnp.maximum(
        jnp.dot(obs.astype(jnp.bfloat16), w1,
                preferred_element_type=jnp.float32) + b1, 0.0)
    h2 = jnp.maximum(
        jnp.dot(h1.astype(jnp.bfloat16), w2,
                preferred_element_type=jnp.float32) + b2, 0.0)
    return jnp.tanh(
        jnp.dot(h2.astype(jnp.bfloat16), w3,
                preferred_element_type=jnp.float32) + b3)


if __name__ == "__main__":
    key = jax.random.PRNGKey(0)
    k_obs, k_obs_big, k_param = jax.random.split(key, 3)

    obs_size, act_size = 32, 8
    params = init_params(k_param, obs_size, act_size)

    # Small-batch case (matches the original toy setup): single full-batch tile.
    batch = 2
    obs = jax.random.normal(k_obs, (batch, obs_size), jnp.float32)
    out = jax.block_until_ready(actor_policy_forward(obs, params, act_size=act_size))
    ref = jax.block_until_ready(reference_forward(obs, params, act_size))
    assert out.shape == (batch, act_size)
    assert jnp.allclose(out, ref, atol=2e-3, rtol=2e-3)

    # Larger batch to exercise the multi-tile grid (3 tiles, partial last one).
    big_batch = 1300
    obs_big = jax.random.normal(k_obs_big, (big_batch, obs_size), jnp.float32)
    out_big = jax.block_until_ready(
        actor_policy_forward(obs_big, params, act_size=act_size))
    ref_big = jax.block_until_ready(reference_forward(obs_big, params, act_size))
    assert out_big.shape == (big_batch, act_size)
    assert jnp.allclose(out_big, ref_big, atol=2e-3, rtol=2e-3)

    print("KERNEL_OK")
</pallas_src>

<mosaic_0001>
module attributes {stable_mosaic.version = 11 : i64} {
  func.func @_mlp_kernel(%arg0: i32, %arg1: memref<2x32xf32, #tpu.memory_space<vmem>>, %arg2: memref<32x512xbf16, #tpu.memory_space<vmem>>, %arg3: memref<1x512xf32, #tpu.memory_space<vmem>>, %arg4: memref<512x384xbf16, #tpu.memory_space<vmem>>, %arg5: memref<1x384xf32, #tpu.memory_space<vmem>>, %arg6: memref<384x128xbf16, #tpu.memory_space<vmem>>, %arg7: memref<1x128xf32, #tpu.memory_space<vmem>>, %arg8: memref<2x128xf32, #tpu.memory_space<vmem>>) attributes {dimension_semantics = [#tpu.dimension_semantics<parallel>], iteration_bounds = array<i64: 1>, scalar_prefetch = 0 : i64, scratch_operands = 0 : i64, tpu.core_type = #tpu.core_type<tc>, window_params = [{transform_indices = @transform_0, window_bounds = array<i64: 2, 32>}, {pipeline_mode = #tpu.pipeline_mode<synchronous>, transform_indices = @transform_1, window_bounds = array<i64: 32, 512>}, {pipeline_mode = #tpu.pipeline_mode<synchronous>, transform_indices = @transform_2, window_bounds = array<i64: 1, 512>}, {pipeline_mode = #tpu.pipeline_mode<synchronous>, transform_indices = @transform_3, window_bounds = array<i64: 512, 384>}, {pipeline_mode = #tpu.pipeline_mode<synchronous>, transform_indices = @transform_4, window_bounds = array<i64: 1, 384>}, {pipeline_mode = #tpu.pipeline_mode<synchronous>, transform_indices = @transform_5, window_bounds = array<i64: 384, 128>}, {pipeline_mode = #tpu.pipeline_mode<synchronous>, transform_indices = @transform_6, window_bounds = array<i64: 1, 128>}, {transform_indices = @transform_7, window_bounds = array<i64: 2, 128>}]} {
    %c0 = arith.constant 0 : index
    %c0_0 = arith.constant 0 : index
    %0 = vector.load %arg1[%c0, %c0_0] : memref<2x32xf32, #tpu.memory_space<vmem>>, vector<2x32xf32>
    %1 = arith.truncf %0 : vector<2x32xf32> to vector<2x32xbf16>
    %c0_1 = arith.constant 0 : index
    %c0_2 = arith.constant 0 : index
    %2 = vector.load %arg2[%c0_1, %c0_2] : memref<32x512xbf16, #tpu.memory_space<vmem>>, vector<32x512xbf16>
    %cst = arith.constant dense<0.000000e+00> : vector<2x512xf32>
    %3 = tpu.matmul %1, %2, %cst {dimension_numbers = #tpu.dot_dimension_numbers<[1], [0], [0], [1], [0, 0, 1, 1], [], []>} : vector<2x32xbf16>, vector<32x512xbf16>, vector<2x512xf32> -> vector<2x512xf32>
    %c0_3 = arith.constant 0 : index
    %c0_4 = arith.constant 0 : index
    %4 = vector.load %arg3[%c0_3, %c0_4] : memref<1x512xf32, #tpu.memory_space<vmem>>, vector<1x512xf32>
    %5 = vector.broadcast %4 : vector<1x512xf32> to vector<2x512xf32>
    %6 = arith.addf %3, %5 : vector<2x512xf32>
    %cst_5 = arith.constant 0.000000e+00 : f32
    %7 = vector.broadcast %cst_5 : f32 to vector<2x512xf32>
    %8 = arith.maximumf %6, %7 : vector<2x512xf32>
    %9 = arith.truncf %8 : vector<2x512xf32> to vector<2x512xbf16>
    %c0_6 = arith.constant 0 : index
    %c0_7 = arith.constant 0 : index
    %10 = vector.load %arg4[%c0_6, %c0_7] : memref<512x384xbf16, #tpu.memory_space<vmem>>, vector<512x384xbf16>
    %cst_8 = arith.constant dense<0.000000e+00> : vector<2x384xf32>
    %11 = tpu.matmul %9, %10, %cst_8 {dimension_numbers = #tpu.dot_dimension_numbers<[1], [0], [0], [1], [0, 0, 1, 1], [], []>} : vector<2x512xbf16>, vector<512x384xbf16>, vector<2x384xf32> -> vector<2x384xf32>
    %c0_9 = arith.constant 0 : index
    %c0_10 = arith.constant 0 : index
    %12 = vector.load %arg5[%c0_9, %c0_10] : memref<1x384xf32, #tpu.memory_space<vmem>>, vector<1x384xf32>
    %13 = vector.broadcast %12 : vector<1x384xf32> to vector<2x384xf32>
    %14 = arith.addf %11, %13 : vector<2x384xf32>
    %cst_11 = arith.constant 0.000000e+00 : f32
    %15 = vector.broadcast %cst_11 : f32 to vector<2x384xf32>
    %16 = arith.maximumf %14, %15 : vector<2x384xf32>
    %17 = arith.truncf %16 : vector<2x384xf32> to vector<2x384xbf16>
    %c0_12 = arith.constant 0 : index
    %c0_13 = arith.constant 0 : index
    %18 = vector.load %arg6[%c0_12, %c0_13] : memref<384x128xbf16, #tpu.memory_space<vmem>>, vector<384x128xbf16>
    %cst_14 = arith.constant dense<0.000000e+00> : vector<2x128xf32>
    %19 = tpu.matmul %17, %18, %cst_14 {dimension_numbers = #tpu.dot_dimension_numbers<[1], [0], [0], [1], [0, 0, 1, 1], [], []>} : vector<2x384xbf16>, vector<384x128xbf16>, vector<2x128xf32> -> vector<2x128xf32>
    %c0_15 = arith.constant 0 : index
    %c0_16 = arith.constant 0 : index
    %20 = vector.load %arg7[%c0_15, %c0_16] : memref<1x128xf32, #tpu.memory_space<vmem>>, vector<1x128xf32>
    %21 = vector.broadcast %20 : vector<1x128xf32> to vector<2x128xf32>
    %22 = arith.addf %19, %21 : vector<2x128xf32>
    %23 = math.tanh %22 : vector<2x128xf32>
    %c0_17 = arith.constant 0 : index
    %c0_18 = arith.constant 0 : index
    %24 = vector.load %arg8[%c0_17, %c0_18] : memref<2x128xf32, #tpu.memory_space<vmem>>, vector<2x128xf32>
    tpu.vector_store %arg8[%c0_17, %c0_18], %23 {strides = array<i32>} : memref<2x128xf32, #tpu.memory_space<vmem>>, vector<2x128xf32>,
    return
  }
  func.func @transform_0(%arg0: i32) -> (i32, i32) {
    %c0_i32 = arith.constant 0 : i32
    %c0_i32_0 = arith.constant 0 : i32
    return %arg0, %c0_i32 : i32, i32
  }
  func.func @transform_1(%arg0: i32) -> (i32, i32) {
    %c0_i32 = arith.constant 0 : i32
    %c0_i32_0 = arith.constant 0 : i32
    %c0_i32_1 = arith.constant 0 : i32
    return %c0_i32, %c0_i32_0 : i32, i32
  }
  func.func @transform_2(%arg0: i32) -> (i32, i32) {
    %c0_i32 = arith.constant 0 : i32
    %c0_i32_0 = arith.constant 0 : i32
    %c0_i32_1 = arith.constant 0 : i32
    return %c0_i32, %c0_i32_0 : i32, i32
  }
  func.func @transform_3(%arg0: i32) -> (i32, i32) {
    %c0_i32 = arith.constant 0 : i32
    %c0_i32_0 = arith.constant 0 : i32
    %c0_i32_1 = arith.constant 0 : i32
    return %c0_i32, %c0_i32_0 : i32, i32
  }
  func.func @transform_4(%arg0: i32) -> (i32, i32) {
    %c0_i32 = arith.constant 0 : i32
    %c0_i32_0 = arith.constant 0 : i32
    %c0_i32_1 = arith.constant 0 : i32
    return %c0_i32, %c0_i32_0 : i32, i32
  }
  func.func @transform_5(%arg0: i32) -> (i32, i32) {
    %c0_i32 = arith.constant 0 : i32
    %c0_i32_0 = arith.constant 0 : i32
    %c0_i32_1 = arith.constant 0 : i32
    return %c0_i32, %c0_i32_0 : i32, i32
  }
  func.func @transform_6(%arg0: i32) -> (i32, i32) {
    %c0_i32 = arith.constant 0 : i32
    %c0_i32_0 = arith.constant 0 : i32
    %c0_i32_1 = arith.constant 0 : i32
    return %c0_i32, %c0_i32_0 : i32, i32
  }
  func.func @transform_7(%arg0: i32) -> (i32, i32) {
    %c0_i32 = arith.constant 0 : i32
    %c0_i32_0 = arith.constant 0 : i32
    return %arg0, %c0_i32 : i32, i32
  }
}

</mosaic_0001>

<bundles_post_ra>
// kernel: actor_policy_forward.1
= control target key start
LH: loop header
LB: loop body
LE: loop exit
PB: predicated region body
PF: predicated region fallthrough
CT: control target
= control target key end

     0   :  { %12 = vsyncpa [#allocation3], 0  ;;  %s2091_s0 = inlined_call_operand.hbm [shape: f32[2,32], index: 0, kind: input, shape index: {}]   ;;  %s2092_s1 = inlined_call_operand.hbm [shape: bf16[32,512], index: 1, kind: input, shape index: {}]   ;;  %s2093_s2 = inlined_call_operand.hbm [shape: f32[1,512], index: 2, kind: input, shape index: {}]   ;;  %s2094_s3 = inlined_call_operand.hbm [shape: bf16[512,384], index: 3, kind: input, shape index: {}]   ;;  %s2095_s4 = inlined_call_operand.vmem [shape: f32[1,384], index: 4, kind: input, shape index: {}]   ;;  %s2096_s5 = inlined_call_operand.hbm [shape: bf16[384,128], index: 5, kind: input, shape index: {}]   ;;  %s2097_s6 = inlined_call_operand.vmem [shape: f32[1,128], index: 6, kind: input, shape index: {}]   ;;  %s2098_s7 = inlined_call_operand.hbm [shape: f32[2,128], index: 7, kind: output, shape index: {}]  }
   0x1   :  { %13 = vsyncpa [#allocation6], 0 }
   0x2   :  { %14 = vsyncpa [#allocation9], 0 }
   0x3   :  { %15 = vsyncpa [#allocation4], 0  ;;  %s1934_s24 = smov [#allocation5]   ;;  %s1794_s28 = scalar_lea.hbm %s2092_s1, 1024 }
   0x4   :  { %s31_s25 = sshll.u32 %s1934_s24, 4  ;;  %p1795_p0 = scmp.ne.s32.totalorder %s2092_s1, %s1794_s28  ;;  %s32_s25 = int_to_ptr.vmem [resolvable:$true] %s31_s25 }
   0x5   :  { %p1798_p1 = scmp.lt.u32.totalorder %s1794_s28, %s2092_s1 }
   0x7   :  { %p1800_p2 = pnand %p1798_p1, %p1795_p0 }
   0x9   :  { %1803 = shalt.err (!%p1800_p2)
}
   0xa   :  { %s1804_s10 = scalar_lea.vmem %s32_s25, 1024  ;;  %p1809_p4 = scmp.lt.s32.totalorder %s32_s25, %s32_s25 }
   0xb   :  { %p1805_p3 = scmp.ne.s32.totalorder %s32_s25, %s1804_s10  ;;  %p1810_p5 = scmp.lt.s32.totalorder %s1804_s10, %s1804_s10 }
   0xd   :  { %p1811_p6 = por %p1810_p5, %p1809_p4 }
   0xf   :  { %p1812_p7 = pnand %p1811_p6, %p1805_p3 }
  0x11   :  { %1815 = shalt.err (!%p1812_p7)
}
  0x12   :  { %s1935_s11 = smov 256   ;;  %s1936_s12 = smov 16  }
  0x13   :  { %37 = dma.hbm_to_vmem [thread:$0]  %s2092_s1, 1024, %s32_s25, [#allocation6], %s1935_s11, %s1935_s11, %s1936_s12  }
  0x14   :  { %s1937_s15 = smov [#allocation8]   ;;  %s1816_s19 = scalar_lea.hbm %s2094_s3, 12288 }
  0x15   :  { %s53_s16 = sshll.u32 %s1937_s15, 4  ;;  %p1817_p8 = scmp.ne.s32.totalorder %s2094_s3, %s1816_s19  ;;  %s54_s16 = int_to_ptr.vmem [resolvable:$true] %s53_s16 }
  0x16   :  { %p1820_p9 = scmp.lt.u32.totalorder %s1816_s19, %s2094_s3 }
  0x18   :  { %p1822_p10 = pnand %p1820_p9, %p1817_p8 }
  0x1a   :  { %1825 = shalt.err (!%p1822_p10)
}
  0x1b   :  { %s1826_s24 = scalar_lea.vmem %s54_s16, 12288  ;;  %p1831_p12 = scmp.lt.s32.totalorder %s54_s16, %s54_s16 }
  0x1c   :  { %p1827_p11 = scmp.ne.s32.totalorder %s54_s16, %s1826_s24  ;;  %p1832_p13 = scmp.lt.s32.totalorder %s1826_s24, %s1826_s24 }
  0x1e   :  { %p1833_p0 = por %p1832_p13, %p1831_p12 }
  0x20   :  { %p1834_p1 = pnand %p1833_p0, %p1827_p11 }
  0x22   :  { %1837 = shalt.err (!%p1834_p1)
}
  0x23   :  { %s1938_s1 = smov 192   ;;  %s1939_s25 = smov 12  }
  0x24   :  { %59 = dma.hbm_to_vmem [thread:$0]  %s2094_s3, 12288, %s54_s16, [#allocation9], %s1938_s1, %s1938_s1, %s1939_s25  }
  0x25   :  { %s1940_s28 = smov [#allocation2]   ;;  %s1941_s30 = smov [#allocation7]  }
  0x26   :  { %s22_s29 = sshll.u32 %s1940_s28, 4  ;;  %s44_s8 = sshll.u32 %s1941_s30, 4  ;;  %s23_s29 = int_to_ptr.vmem [resolvable:$true] %s22_s29  ;;  %s45_s8 = int_to_ptr.vmem [resolvable:$true] %s44_s8 }
  0x27   :  { %s1838_s11 = scalar_lea.hbm %s2091_s0, 32 }
  0x28   :  { %p1839_p2 = scmp.ne.s32.totalorder %s2091_s0, %s1838_s11  ;;  %p1842_p3 = scmp.lt.u32.totalorder %s1838_s11, %s2091_s0 }
  0x2a   :  { %p1844_p4 = pnand %p1842_p3, %p1839_p2 }
  0x2c   :  { %1847 = shalt.err (!%p1844_p4)
}
  0x2d   :  { %s1848_s3 = scalar_lea.vmem %s23_s29, 32  ;;  %p1853_p6 = scmp.lt.s32.totalorder %s23_s29, %s23_s29 }
  0x2e   :  { %p1849_p5 = scmp.ne.s32.totalorder %s23_s29, %s1848_s3  ;;  %p1854_p7 = scmp.lt.s32.totalorder %s1848_s3, %s1848_s3 }
  0x30   :  { %p1855_p8 = por %p1854_p7, %p1853_p6 }
  0x32   :  { %p1856_p9 = pnand %p1855_p8, %p1849_p5 }
  0x34   :  { %1859 = shalt.err (!%p1856_p9)
}
  0x35   :  { %25 = dma.hbm_to_vmem [thread:$0]  %s2091_s0, 32, %s23_s29, [#allocation3]  }
  0x36   :  { %s1860_s20 = scalar_lea.hbm %s2093_s2, 64 }
  0x37   :  { %p1861_p10 = scmp.ne.s32.totalorder %s2093_s2, %s1860_s20  ;;  %p1864_p11 = scmp.lt.u32.totalorder %s1860_s20, %s2093_s2 }
  0x39   :  { %p1866_p12 = pnand %p1864_p11, %p1861_p10 }
  0x3b   :  { %1869 = shalt.err (!%p1866_p12)
}
  0x3c   :  { %s1870_s1 = scalar_lea.vmem %s45_s8, 64  ;;  %p1875_p0 = scmp.lt.s32.totalorder %s45_s8, %s45_s8 }
  0x3d   :  { %p1871_p13 = scmp.ne.s32.totalorder %s45_s8, %s1870_s1  ;;  %p1876_p1 = scmp.lt.s32.totalorder %s1870_s1, %s1870_s1 }
  0x3f   :  { %p1877_p2 = por %p1876_p1, %p1875_p0 }
  0x41   :  { %p1878_p3 = pnand %p1877_p2, %p1871_p13 }
  0x43   :  { %1881 = shalt.err (!%p1878_p3)
}
  0x44   :  { %47 = dma.hbm_to_vmem [thread:$0]  %s2093_s2, 64, %s45_s8, [#allocation6]  }
  0x45   :  { %s1942_s26 = smov [#allocation10]   ;;  %s1882_s30 = scalar_lea.hbm %s2096_s5, 3072 }
  0x46   :  { %s67_s27 = sshll.u32 %s1942_s26, 4  ;;  %p1883_p4 = scmp.ne.s32.totalorder %s2096_s5, %s1882_s30  ;;  %s68_s27 = int_to_ptr.vmem [resolvable:$true] %s67_s27 }
  0x47   :  { %p1886_p5 = scmp.lt.u32.totalorder %s1882_s30, %s2096_s5 }
  0x49   :  { %p1888_p6 = pnand %p1886_p5, %p1883_p4 }
  0x4b   :  { %1891 = shalt.err (!%p1888_p6)
}
  0x4c   :  { %s1892_s13 = scalar_lea.vmem %s68_s27, 3072  ;;  %p1897_p8 = scmp.lt.s32.totalorder %s68_s27, %s68_s27 }
  0x4d   :  { %p1893_p7 = scmp.ne.s32.totalorder %s68_s27, %s1892_s13  ;;  %p1898_p9 = scmp.lt.s32.totalorder %s1892_s13, %s1892_s13 }
  0x4f   :  { %p1899_p10 = por %p1898_p9, %p1897_p8 }
  0x51   :  { %p1900_p11 = pnand %p1899_p10, %p1893_p7 }
  0x53   :  { %1903 = shalt.err (!%p1900_p11)
}
  0x54   :  { %s1943_s2 = smov 64   ;;  %s1944_s8 = smov 4  }
  0x55   :  { %73 = dma.hbm_to_vmem [thread:$0]  %s2096_s5, 3072, %s68_s27, [#allocation9], %s1943_s2, %s1943_s2, %s1944_s8  }
  0x56   :  { %1926 = dma.done.wait [#allocation3], 32  }
  0x57   :  { %1927 = vsyncadd [#allocation3], 4294967264 }
  0x58   :  { %1928 = dma.done.wait [#allocation6], 1088  }
  0x59   :  { %1929 = vsyncadd [#allocation6], 4294966208 }
  0x5a   :  { %1930 = dma.done.wait [#allocation9], 15360  }
  0x5b   :  { %1931 = vsyncadd [#allocation9], 4294951936  ;;  %v1945_v0 = vmov 0   ;;  %v1628_v1 = vld [vmem:[#allocation5 + $0x4] ss:$16 sps:$4 sm:$0xff]   ;;  %vm164_vm0 = vcmask 261120   ;;  %v104_v61 = vlaneseq }
  0x5c   :  { %200 = vmatprep.mubr.bf16.mxu0 %v1945_v0  ;;  %241 = vmatprep.mubr.bf16.mxu1 %v1945_v0  ;;  %v1630_v2 = vld [vmem:[#allocation5] ss:$16 sps:$4 sm:$0xff]   ;;  %v1631_v3 = vld [vmem:[#allocation5 + $0x24] ss:$16 sps:$4 sm:$0xff]   ;;  %v92_v5 = vld [vmem:[#allocation2] sm:$0x3] }
  0x5d   :  { %168 = vmatprep.subr.bf16.mxu0 %v1628_v1  ;;  %v1633_v4 = vld [vmem:[#allocation5 + $0x20] ss:$16 sps:$4 sm:$0xff]   ;;  %v1634_v6 = vld [vmem:[#allocation5 + $0xc] ss:$16 sps:$4 sm:$0xff]   ;;  %v1636_v7 = vld [vmem:[#allocation5 + $0x8] ss:$16 sps:$4 sm:$0xff]   ;;  %v93_v9 = vpack.c.bf16 %v92_v5, %v92_v5 }
  0x5e   :  { %169 = vmatpush1.bf16.msra.mxu0 %v1630_v2  ;;  %209 = vmatprep.subr.bf16.mxu1 %v1634_v6  ;;  %v1637_v8 = vld [vmem:[#allocation5 + $0x2c] ss:$16 sps:$4 sm:$0xff]   ;;  %v1639_v10 = vld [vmem:[#allocation5 + $0x28] ss:$16 sps:$4 sm:$0xff]   ;;  %v1640_v12 = vld [vmem:[#allocation8] ss:$12 sps:$4 sm:$0xff]  }
  0x5f   :  { %170 = vmatprep.subr.bf16.mxu0 %v1631_v3  ;;  %210 = vmatpush1.bf16.msra.mxu1 %v1636_v7  ;;  %v1642_v11 = vld [vmem:[#allocation8 + $0x4] ss:$12 sps:$4 sm:$0xff]   ;;  %v1645_v13 = vld [vmem:[#allocation8 + $0x1c] ss:$12 sps:$4 sm:$0xff]   ;;  %v1648_v15 = vld [vmem:[#allocation8 + $0x34] ss:$12 sps:$4 sm:$0xff]  }
  0x60   :  { %211 = vmatprep.subr.bf16.mxu1 %v1637_v8  ;;  %v1643_v14 = vld [vmem:[#allocation8 + $0x18] ss:$12 sps:$4 sm:$0xff]   ;;  %v1646_v16 = vld [vmem:[#allocation8 + $0x30] ss:$12 sps:$4 sm:$0xff]   ;;  %v1649_v18 = vld [vmem:[#allocation8 + $0x48] ss:$12 sps:$4 sm:$0xff]  }
  0x61   :  { %v1651_v17 = vld [vmem:[#allocation8 + $0x4c] ss:$12 sps:$4 sm:$0xff]   ;;  %v1667_v19 = vld [vmem:[#allocation8 + $0xc8] ss:$12 sps:$4 sm:$0xff]   ;;  %v1654_v21 = vld [vmem:[#allocation8 + $0x64] ss:$12 sps:$4 sm:$0xff]  }
  0x62   :  { %171 = vmatpush1.bf16.msra.mxu0 %v1633_v4  ;;  %v1668_v20 = vld [vmem:[#allocation8 + $0x8] ss:$12 sps:$4 sm:$0xff]   ;;  %v1672_v22 = vld [vmem:[#allocation8 + $0xe0] ss:$12 sps:$4 sm:$0xff]   ;;  %v1677_v26 = vld [vmem:[#allocation8 + $0xf8] ss:$12 sps:$4 sm:$0xff]  }
  0x63   :  { %915 = vmatprep.subr.bf16.mxu0 %v1642_v11  ;;  %212 = vmatpush1.bf16.msra.mxu1 %v1639_v10  ;;  %v1673_v23 = vld [vmem:[#allocation8 + $0x20] ss:$12 sps:$4 sm:$0xff]   ;;  %v1657_v25 = vld [vmem:[#allocation8 + $0x7c] ss:$12 sps:$4 sm:$0xff]   ;;  %v1678_v27 = vld [vmem:[#allocation8 + $0x38] ss:$12 sps:$4 sm:$0xff]  }
  0x64   :  { %1512 = vmatprep.subr.bf16.mxu1 %v1667_v19  ;;  %v1652_v24 = vld [vmem:[#allocation8 + $0x60] ss:$12 sps:$4 sm:$0xff]   ;;  %v1655_v28 = vld [vmem:[#allocation8 + $0x78] ss:$12 sps:$4 sm:$0xff]   ;;  %v1682_v30 = vld [vmem:[#allocation8 + $0x110] ss:$12 sps:$4 sm:$0xff]  }
  0x65   :  { %1389 = vmatmul.mubr.msk.bf16.vlgmr.msra.gmra.mrb[0].mxu0 %vm164_vm0, %v93_v9  ;;  %v1660_v29 = vld [vmem:[#allocation8 + $0x94] ss:$12 sps:$4 sm:$0xff]   ;;  %v1683_v31 = vld [vmem:[#allocation8 + $0x50] ss:$12 sps:$4 sm:$0xff]   ;;  %v1663_v34 = vld [vmem:[#allocation8 + $0xac] ss:$12 sps:$4 sm:$0xff]  }
  0x66   :  { %916 = vmatpush1.bf16.msra.mxu0 %v1640_v12  ;;  %1390 = vmatmul.mubr.msk.bf16.vlgmr.msra.gmra.mrb[0].mxu1 %vm164_vm0, %v93_v9  ;;  %v1658_v32 = vld [vmem:[#allocation8 + $0x90] ss:$12 sps:$4 sm:$0xff]   ;;  %v1687_v33 = vld [vmem:[#allocation8 + $0x128] ss:$12 sps:$4 sm:$0xff]   ;;  %v1692_v37 = vld [vmem:[#allocation8 + $0x140] ss:$12 sps:$4 sm:$0xff]  }
  0x67   :  { %917 = vmatprep.subr.bf16.mxu0 %v1645_v13  ;;  %1513 = vmatpush3.bf16.msra.mxu1 %v1668_v20  ;;  %v1688_v35 = vld [vmem:[#allocation8 + $0x68] ss:$12 sps:$4 sm:$0xff]   ;;  %v1666_v38 = vld [vmem:[#allocation8 + $0xc4] ss:$12 sps:$4 sm:$0xff]   ;;  %v1693_v39 = vld [vmem:[#allocation8 + $0x80] ss:$12 sps:$4 sm:$0xff]  }
  0x68   :  { %1514 = vmatprep.subr.bf16.mxu1 %v1672_v22  ;;  %v1661_v36 = vld [vmem:[#allocation8 + $0xa8] ss:$12 sps:$4 sm:$0xff]   ;;  %v1664_v40 = vld [vmem:[#allocation8 + $0xc0] ss:$12 sps:$4 sm:$0xff]   ;;  %v1669_v42 = vld [vmem:[#allocation8 + $0xd8] ss:$12 sps:$4 sm:$0xff]  }
  0x69   :  { %v1671_v41 = vld [vmem:[#allocation8 + $0xdc] ss:$12 sps:$4 sm:$0xff]   ;;  %v1676_v43 = vld [vmem:[#allocation8 + $0xf4] ss:$12 sps:$4 sm:$0xff]   ;;  %v1681_v45 = vld [vmem:[#allocation8 + $0x10c] ss:$12 sps:$4 sm:$0xff]  }
  0x6a   :  { %918 = vmatpush1.bf16.msra.mxu0 %v1643_v14  ;;  %v1674_v44 = vld [vmem:[#allocation8 + $0xf0] ss:$12 sps:$4 sm:$0xff]   ;;  %v1679_v46 = vld [vmem:[#allocation8 + $0x108] ss:$12 sps:$4 sm:$0xff]   ;;  %v1684_v48 = vld [vmem:[#allocation8 + $0x120] ss:$12 sps:$4 sm:$0xff]  }
  0x6b   :  { %919 = vmatprep.subr.bf16.mxu0 %v1648_v15  ;;  %1515 = vmatpush3.bf16.msra.mxu1 %v1673_v23  ;;  %v1686_v47 = vld [vmem:[#allocation8 + $0x124] ss:$12 sps:$4 sm:$0xff]   ;;  %v1691_v49 = vld [vmem:[#allocation8 + $0x13c] ss:$12 sps:$4 sm:$0xff]   ;;  %v1696_v51 = vld [vmem:[#allocation8 + $0x154] ss:$12 sps:$4 sm:$0xff]  }
  0x6c   :  { %1516 = vmatprep.subr.bf16.mxu1 %v1677_v26  ;;  %v1689_v50 = vld [vmem:[#allocation8 + $0x138] ss:$12 sps:$4 sm:$0xff]   ;;  %v1694_v53 = vld [vmem:[#allocation8 + $0x150] ss:$12 sps:$4 sm:$0xff]   ;;  %v1699_v57 = vld [vmem:[#allocation8 + $0x168] ss:$12 sps:$4 sm:$0xff]  }
  0x6d   :  { %v1697_v52 = vld [vmem:[#allocation8 + $0x158] ss:$12 sps:$4 sm:$0xff]   ;;  %v1702_v56 = vld [vmem:[#allocation8 + $0x170] ss:$12 sps:$4 sm:$0xff]   ;;  %v1707_v60 = vld [vmem:[#allocation8 + $0x248] ss:$12 sps:$4 sm:$0xff]  }
  0x6e   :  { %920 = vmatpush1.bf16.msra.mxu0 %v1646_v16  ;;  %v1698_v54 = vld [vmem:[#allocation8 + $0x98] ss:$12 sps:$4 sm:$0xff]   ;;  %v1703_v58 = vld [vmem:[#allocation8 + $0xb0] ss:$12 sps:$4 sm:$0xff]   ;;  %v2049_v62 = vshrl.u32 %v104_v61, 7  ;;  %vm1947_vm1 = vmmov 0  }
  0x6f   :  { %921 = vmatprep.subr.bf16.mxu0 %v1651_v17  ;;  %1517 = vmatpush3.bf16.msra.mxu1 %v1678_v27  ;;  %v1701_v55 = vld [vmem:[#allocation8 + $0x16c] ss:$12 sps:$4 sm:$0xff]   ;;  %v1706_v59 = vld [vmem:[#allocation8 + $0x184] ss:$12 sps:$4 sm:$0xff]   ;;  %v2052_v0 = vld [vmem:[#allocation7] sm:$0xf] }
  0x70   :  { %1518 = vmatprep.subr.bf16.mxu1 %v1682_v30  ;;  %v106_v63 = vsub.s32 0, %v2049_v62  ;;  %v110_v1 = vsub.s32 1, %v2049_v62  ;;  %v118_v3 = vsub.s32 3, %v2049_v62  ;;  %v1704_v19 = vld [vmem:[#allocation8 + $0x180] ss:$12 sps:$4 sm:$0xff]   ;;  %s1948_s17 = smov [#allocation11]  }
  0x71   :  { %v1708_v20 = vld [vmem:[#allocation8 + $0x188] ss:$12 sps:$4 sm:$0xff]   ;;  %v1709_v27 = vld [vmem:[#allocation8 + $0x198] ss:$12 sps:$4 sm:$0xff]   ;;  %s1370_s18 = sshll.u32 %s1948_s17, 4  ;;  %s1371_s18 = int_to_ptr.vmem [resolvable:$true] %s1370_s18 }
  0x72   :  { %922 = vmatpush1.bf16.msra.mxu0 %v1649_v18  ;;  %v107_v2 = vrot.slane %v2052_v0, %v106_v63  ;;  %v111_v4 = vrot.slane %v2052_v0, %v110_v1  ;;  %v119_v8 = vrot.slane %v2052_v0, %v118_v3  ;;  %v1711_v23 = vld [vmem:[#allocation8 + $0x19c] ss:$12 sps:$4 sm:$0xff]   ;;  %v1717_v30 = vld [vmem:[#allocation8 + $0x278] ss:$12 sps:$4 sm:$0xff]   ;;  %s1904_s19 = scalar_lea.vmem %s1371_s18, 32  ;;  %p1909_p13 = scmp.lt.s32.totalorder %s1371_s18, %s1371_s18 }
  0x73   :  { %923 = vmatprep.subr.bf16.mxu0 %v1654_v21  ;;  %1519 = vmatpush3.bf16.msra.mxu1 %v1683_v31  ;;  %v1714_v31 = vld [vmem:[#allocation8 + $0x1b0] ss:$12 sps:$4 sm:$0xff]   ;;  %v1747_v61 = vld [vmem:[#allocation8 + $0x258] ss:$12 sps:$4 sm:$0xff]   ;;  %p1905_p12 = scmp.ne.s32.totalorder %s1371_s18, %s1904_s19  ;;  %p1910_p0 = scmp.lt.s32.totalorder %s1904_s19, %s1904_s19 }
  0x74   :  { %1520 = vmatprep.subr.bf16.mxu1 %v1687_v33  ;;  %v1721_v33 = vld [vmem:[#allocation8 + $0x1cc] ss:$12 sps:$4 sm:$0xff]  }
  0x75   :  { %v1755_v3 = vld [vmem:[#allocation8 + $0x28c] ss:$12 sps:$4 sm:$0xff]   ;;  %p1911_p1 = por %p1910_p0, %p1909_p13 }
  0x76   :  { %924 = vmatpush1.bf16.msra.mxu0 %v1652_v24  ;;  %v1712_v24 = vld [vmem:[#allocation8 + $0x260] ss:$12 sps:$4 sm:$0xff]  }
  0x77   :  { %925 = vmatprep.subr.bf16.mxu0 %v1657_v25  ;;  %1521 = vmatpush3.bf16.msra.mxu1 %v1688_v35  ;;  %v1719_v35 = vld [vmem:[#allocation8 + $0x1c8] ss:$12 sps:$4 sm:$0xff]   ;;  %p1912_p2 = pnand %p1911_p1, %p1905_p12 }
  0x78   :  { %1522 = vmatprep.subr.bf16.mxu1 %v1692_v37  ;;  %v1726_v37 = vld [vmem:[#allocation8 + $0x1e4] ss:$12 sps:$4 sm:$0xff]  }
  0x7a   :  { %926 = vmatpush1.bf16.msra.mxu0 %v1655_v28  ;;  %v1713_v28 = vld [vmem:[#allocation8 + $0x1a0] ss:$12 sps:$4 sm:$0xff]  }
  0x7b   :  { %927 = vmatprep.subr.bf16.mxu0 %v1660_v29  ;;  %1523 = vmatpush3.bf16.msra.mxu1 %v1693_v39  ;;  %v1716_v29 = vld [vmem:[#allocation8 + $0x1b4] ss:$12 sps:$4 sm:$0xff]   ;;  %v114_v39 = vsub.s32 2, %v2049_v62 }
  0x7c   :  { %1524 = vmatprep.subr.bf16.mxu1 %v1697_v52  ;;  %v1741_v52 = vld [vmem:[#allocation8 + $0x22c] ss:$12 sps:$4 sm:$0xff]   ;;  %v1786_v62 = vld [vmem:[#allocation10 + $0x90] sm:$0xff]  }
  0x7e   :  { %928 = vmatpush1.bf16.msra.mxu0 %v1658_v32  ;;  %v1718_v32 = vld [vmem:[#allocation8 + $0x1b8] ss:$12 sps:$4 sm:$0xff]  }
  0x7f   :  { %929 = vmatprep.subr.bf16.mxu0 %v1663_v34  ;;  %1525 = vmatpush3.bf16.msra.mxu1 %v1698_v54  ;;  %v1722_v34 = vld [vmem:[#allocation8 + $0x290] ss:$12 sps:$4 sm:$0xff]  }
  0x80   :  { %1526 = vmatprep.subr.bf16.mxu1 %v1702_v56  ;;  %v1743_v56 = vld [vmem:[#allocation8 + $0x230] ss:$12 sps:$4 sm:$0xff]  }
  0x82   :  { %930 = vmatpush1.bf16.msra.mxu0 %v1661_v36  ;;  %v1723_v36 = vld [vmem:[#allocation8 + $0x1d0] ss:$12 sps:$4 sm:$0xff]  }
  0x83   :  { %931 = vmatprep.subr.bf16.mxu0 %v1666_v38  ;;  %1527 = vmatpush3.bf16.msra.mxu1 %v1703_v58  ;;  %v1727_v38 = vld [vmem:[#allocation8 + $0x2a8] ss:$12 sps:$4 sm:$0xff]  }
  0x84   :  { %1534 = vmatprep.subr.bf16.mxu1 %v1707_v60  ;;  %v1749_v60 = vld [vmem:[#allocation8 + $0x25c] ss:$12 sps:$4 sm:$0xff]  }
  0x86   :  { %932 = vmatpush1.bf16.msra.mxu0 %v1664_v40  ;;  %v1724_v40 = vld [vmem:[#allocation8 + $0x1e0] ss:$12 sps:$4 sm:$0xff]  }
  0x87   :  { %933 = vmatprep.subr.bf16.mxu0 %v1671_v41  ;;  %v1728_v41 = vld [vmem:[#allocation8 + $0x1e8] ss:$12 sps:$4 sm:$0xff]  }
  0x8a   :  { %934 = vmatpush1.bf16.msra.mxu0 %v1669_v42  ;;  %v1731_v42 = vld [vmem:[#allocation8 + $0x1fc] ss:$12 sps:$4 sm:$0xff]  }
  0x8b   :  { %935 = vmatprep.subr.bf16.mxu0 %v1676_v43  ;;  %v1732_v43 = vld [vmem:[#allocation8 + $0x2c0] ss:$12 sps:$4 sm:$0xff]  }
  0x8e   :  { %936 = vmatpush1.bf16.msra.mxu0 %v1674_v44  ;;  %v115_v44 = vrot.slane %v2052_v0, %v114_v39  ;;  %v1752_v0 = vld [vmem:[#allocation8 + $0x274] ss:$12 sps:$4 sm:$0xff]  }
  0x8f   :  { %937 = vmatprep.subr.bf16.mxu0 %v1681_v45  ;;  %v1729_v45 = vld [vmem:[#allocation8 + $0x1f8] ss:$12 sps:$4 sm:$0xff]  }
  0x92   :  { %938 = vmatpush1.bf16.msra.mxu0 %v1679_v46  ;;  %v1733_v46 = vld [vmem:[#allocation8 + $0x200] ss:$12 sps:$4 sm:$0xff]  }
  0x93   :  { %939 = vmatprep.subr.bf16.mxu0 %v1686_v47  ;;  %v1736_v47 = vld [vmem:[#allocation8 + $0x214] ss:$12 sps:$4 sm:$0xff]  }
  0x96   :  { %940 = vmatpush1.bf16.msra.mxu0 %v1684_v48  ;;  %v1737_v48 = vld [vmem:[#allocation8 + $0x2d8] ss:$12 sps:$4 sm:$0xff]  }
  0x97   :  { %941 = vmatprep.subr.bf16.mxu0 %v1691_v49 }
  0x9a   :  { %942 = vmatpush1.bf16.msra.mxu0 %v1689_v50  ;;  %v1734_v50 = vld [vmem:[#allocation8 + $0x210] ss:$12 sps:$4 sm:$0xff]  }
  0x9b   :  { %943 = vmatprep.subr.bf16.mxu0 %v1696_v51  ;;  %v1738_v51 = vld [vmem:[#allocation8 + $0x218] ss:$12 sps:$4 sm:$0xff]  }
  0x9e   :  { %944 = vmatpush1.bf16.msra.mxu0 %v1694_v53  ;;  %v1742_v53 = vld [vmem:[#allocation8 + $0x2f0] ss:$12 sps:$4 sm:$0xff]  }
  0x9f   :  { %945 = vmatprep.subr.bf16.mxu0 %v1701_v55  ;;  %v1739_v55 = vld [vmem:[#allocation8 + $0x228] ss:$12 sps:$4 sm:$0xff]  }
  0xa2   :  { %946 = vmatpush1.bf16.msra.mxu0 %v1699_v57  ;;  %v1746_v57 = vld [vmem:[#allocation8 + $0x244] ss:$12 sps:$4 sm:$0xff]  }
  0xa3   :  { %956 = vmatprep.subr.bf16.mxu0 %v1706_v59  ;;  %v1744_v59 = vld [vmem:[#allocation8 + $0x240] ss:$12 sps:$4 sm:$0xff]  }
 0x138   :  { %v202_v5 = vpop.f32.mrb[0].mxu0 }
 0x139   :  { %v203_v6 = vadd.f32 %v202_v5, %v107_v2  ;;  %v204_v7 = vpop.f32.mrb[1].mxu0  ;;  %v243_v13 = vpop.f32.mrb[0].mxu1  ;;  %v1750_v2 = vld [vmem:[#allocation8 + $0x270] ss:$12 sps:$4 sm:$0xff]  }
 0x13a   :  { %v205_v9 = vadd.f32 %v204_v7, %v111_v4  ;;  %v206_v10 = vpop.f32.mrb[2].mxu0  ;;  %v245_v15 = vpop.f32.mrb[1].mxu1  ;;  %v244_v49 = vadd.f32 %v243_v13, %v115_v44  ;;  %v1753_v4 = vld [vmem:[#allocation8 + $0x288] ss:$12 sps:$4 sm:$0xff]   ;;  %v1758_v5 = vld [vmem:[#allocation8 + $0x2a4] ss:$12 sps:$4 sm:$0xff]  }
 0x13b   :  { %v250_v11 = vmax.f32 %v203_v6, 0.0  ;;  %v207_v12 = vpop.f32.mrb[3].mxu0  ;;  %v246_v16 = vadd.f32 %v245_v15, %v119_v8  ;;  %v247_v17 = vpop.f32.mrb[2].mxu1  ;;  %v1756_v6 = vld [vmem:[#allocation8 + $0x2a0] ss:$12 sps:$4 sm:$0xff]  }
 0x13c   :  { %v251_v14 = vmax.f32 %v205_v9, 0.0  ;;  %v248_v21 = vpop.f32.mrb[3].mxu1  ;;  %v252_v54 = vmax.f32 %v244_v49, 0.0  ;;  %v1761_v7 = vld [vmem:[#allocation8 + $0x2bc] ss:$12 sps:$4 sm:$0xff]   ;;  %v1768_v13 = vld [vmem:[#allocation10 + $0x40] sm:$0xff]  }
 0x13d   :  { %v254_v22 = vpack.c.bf16 %v250_v11, %v250_v11  ;;  %v253_v25 = vmax.f32 %v246_v16, 0.0  ;;  %v1759_v8 = vld [vmem:[#allocation8 + $0x2b8] ss:$12 sps:$4 sm:$0xff]   ;;  %v1764_v9 = vld [vmem:[#allocation8 + $0x2d4] ss:$12 sps:$4 sm:$0xff]   ;;  %v1770_v15 = vld [vmem:[#allocation10 + $0x48] sm:$0xff]  }
 0x13e   :  { %v255_v18 = vpack.c.bf16 %v251_v14, %v251_v14  ;;  %v256_v58 = vpack.c.bf16 %v252_v54, %v252_v54  ;;  %v1762_v10 = vld [vmem:[#allocation8 + $0x2d0] ss:$12 sps:$4 sm:$0xff]   ;;  %v1767_v11 = vld [vmem:[#allocation8 + $0x2ec] ss:$12 sps:$4 sm:$0xff]   ;;  %v1765_v12 = vld [vmem:[#allocation8 + $0x2e8] ss:$12 sps:$4 sm:$0xff]  }
 0x13f   :  { %v257_v26 = vpack.c.bf16 %v253_v25, %v253_v25  ;;  %v1769_v14 = vld [vmem:[#allocation10] sm:$0xff]   ;;  %v1771_v16 = vld [vmem:[#allocation10 + $0x8] sm:$0xff]   ;;  %v1772_v17 = vld [vmem:[#allocation10 + $0x50] sm:$0xff]  }
 0x140   :  { %947 = vmatprep.mubr.bf16.mxu0 %v255_v18  ;;  %1029 = vmatprep.mubr.bf16.mxu1 %v255_v18  ;;  %v1773_v18 = vld [vmem:[#allocation10 + $0x10] sm:$0xff]   ;;  %v1776_v21 = vld [vmem:[#allocation10 + $0x60] sm:$0xff]  }
 0x141   :  { %948 = vmatmul.mubr.bf16.vlgmr.msra.gmra.mrb[4].mxu0 %v254_v22  ;;  %1030 = vmatmul.mubr.bf16.vlgmr.msra.gmra.mrb[4].mxu1 %v254_v22  ;;  %v1777_v22 = vld [vmem:[#allocation10 + $0x20] sm:$0xff]   ;;  %v1780_v25 = vld [vmem:[#allocation10 + $0x70] sm:$0xff]  }
 0x142   :  { %957 = vmatpush1.bf16.msra.mxu0 %v1704_v19  ;;  %1535 = vmatpush3.bf16.msra.mxu1 %v1708_v20  ;;  %v1774_v19 = vld [vmem:[#allocation10 + $0x58] sm:$0xff]  }
 0x143   :  { %958 = vmatprep.subr.bf16.mxu0 %v1711_v23  ;;  %1536 = vmatprep.subr.bf16.mxu1 %v1712_v24  ;;  %v1775_v20 = vld [vmem:[#allocation10 + $0x18] sm:$0xff]   ;;  %v1778_v23 = vld [vmem:[#allocation10 + $0x68] sm:$0xff]  }
 0x144   :  { %1069 = vmatprep.mubr.bf16.mxu1 %v257_v26  ;;  %988 = vmatprep.mubr.bf16.mxu0 %v257_v26  ;;  %v1779_v24 = vld [vmem:[#allocation10 + $0x28] sm:$0xff]   ;;  %v1781_v26 = vld [vmem:[#allocation10 + $0x30] sm:$0xff]  }
 0x146   :  { %959 = vmatpush1.bf16.msra.mxu0 %v1709_v27  ;;  %1537 = vmatpush3.bf16.msra.mxu1 %v1713_v28  ;;  %v1782_v27 = vld [vmem:[#allocation10 + $0x78] sm:$0xff]  }
 0x147   :  { %960 = vmatprep.subr.bf16.mxu0 %v1716_v29  ;;  %1538 = vmatprep.subr.bf16.mxu1 %v1717_v30  ;;  %v1783_v28 = vld [vmem:[#allocation10 + $0x38] sm:$0xff]   ;;  %v1946_v29 = vmov 0.0  }
 0x14a   :  { %961 = vmatpush1.bf16.msra.mxu0 %v1714_v31  ;;  %1539 = vmatpush3.bf16.msra.mxu1 %v1718_v32 }
 0x14b   :  { %962 = vmatprep.subr.bf16.mxu0 %v1721_v33  ;;  %1540 = vmatprep.subr.bf16.mxu1 %v1722_v34 }
 0x14e   :  { %963 = vmatpush1.bf16.msra.mxu0 %v1719_v35  ;;  %1541 = vmatpush3.bf16.msra.mxu1 %v1723_v36  ;;  %v386_v35 = vld [vmem:[%s2095_s4] sm:$0x7] }
 0x14f   :  { %964 = vmatprep.subr.bf16.mxu0 %v1726_v37  ;;  %1542 = vmatprep.subr.bf16.mxu1 %v1727_v38  ;;  %v399_v36 = vrot.slane %v386_v35, %v114_v39 }
 0x152   :  { %965 = vmatpush1.bf16.msra.mxu0 %v1724_v40  ;;  %1543 = vmatpush3.bf16.msra.mxu1 %v1728_v41 }
 0x153   :  { %966 = vmatprep.subr.bf16.mxu0 %v1731_v42  ;;  %1544 = vmatprep.subr.bf16.mxu1 %v1732_v43 }
 0x156   :  { %967 = vmatpush1.bf16.msra.mxu0 %v1729_v45  ;;  %1545 = vmatpush3.bf16.msra.mxu1 %v1733_v46  ;;  %v391_v45 = vrot.slane %v386_v35, %v106_v63  ;;  %v395_v46 = vrot.slane %v386_v35, %v110_v1  ;;  %v1787_v63 = vld [vmem:[#allocation10 + $0x98] sm:$0xff]   ;;  %v1788_v1 = vld [vmem:[#allocation10 + $0xa0] sm:$0xff]  }
 0x157   :  { %968 = vmatprep.subr.bf16.mxu0 %v1736_v47  ;;  %1546 = vmatprep.subr.bf16.mxu1 %v1737_v48 }
 0x15a   :  { %969 = vmatpush1.bf16.msra.mxu0 %v1734_v50  ;;  %1547 = vmatpush3.bf16.msra.mxu1 %v1738_v51 }
 0x15b   :  { %970 = vmatprep.subr.bf16.mxu0 %v1741_v52  ;;  %1548 = vmatprep.subr.bf16.mxu1 %v1742_v53 }
 0x15e   :  { %971 = vmatpush1.bf16.msra.mxu0 %v1739_v55  ;;  %1549 = vmatpush3.bf16.msra.mxu1 %v1743_v56  ;;  %v1784_v55 = vld [vmem:[#allocation10 + $0x80] sm:$0xff]  }
 0x15f   :  { %972 = vmatprep.subr.bf16.mxu0 %v1746_v57  ;;  %1556 = vmatprep.subr.bf16.mxu1 %v1768_v13  ;;  %v1785_v57 = vld [vmem:[#allocation10 + $0x88] sm:$0xff]  }
 0x161   :  { %1070 = vmatmul.mubr.bf16.vlgmr.msra.gmra.mrb[8].mxu1 %v256_v58 }
 0x162   :  { %973 = vmatpush1.bf16.msra.mxu0 %v1744_v59  ;;  %1557 = vmatpush3.bf16.msra.mxu1 %v1769_v14  ;;  %v1790_v59 = vld [vmem:[#allocation10 + $0xb0] sm:$0xff]  }
 0x163   :  { %974 = vmatprep.subr.bf16.mxu0 %v1749_v60  ;;  %1558 = vmatprep.subr.bf16.mxu1 %v1770_v15  ;;  %v1791_v60 = vld [vmem:[#allocation10 + $0xb8] sm:$0xff]  }
 0x166   :  { %975 = vmatpush1.bf16.msra.mxu0 %v1747_v61  ;;  %1559 = vmatpush3.bf16.msra.mxu1 %v1771_v16 }
 0x167   :  { %976 = vmatprep.subr.bf16.mxu0 %v1752_v0  ;;  %1560 = vmatprep.subr.bf16.mxu1 %v1772_v17 }
 0x16a   :  { %977 = vmatpush1.bf16.msra.mxu0 %v1750_v2  ;;  %1561 = vmatpush3.bf16.msra.mxu1 %v1773_v18 }
 0x16b   :  { %978 = vmatprep.subr.bf16.mxu0 %v1755_v3  ;;  %1562 = vmatprep.subr.bf16.mxu1 %v1774_v19 }
 0x16e   :  { %979 = vmatpush1.bf16.msra.mxu0 %v1753_v4  ;;  %1563 = vmatpush3.bf16.msra.mxu1 %v1775_v20 }
 0x16f   :  { %980 = vmatprep.subr.bf16.mxu0 %v1758_v5  ;;  %1564 = vmatprep.subr.bf16.mxu1 %v1776_v21 }
 0x172   :  { %981 = vmatpush1.bf16.msra.mxu0 %v1756_v6  ;;  %1565 = vmatpush3.bf16.msra.mxu1 %v1777_v22 }
 0x173   :  { %982 = vmatprep.subr.bf16.mxu0 %v1761_v7  ;;  %1566 = vmatprep.subr.bf16.mxu1 %v1778_v23  ;;  %v1487_v7 = vld [vmem:[%s2097_s6] ss:$0 sm:$0xff] }
 0x176   :  { %983 = vmatpush1.bf16.msra.mxu0 %v1759_v8  ;;  %1567 = vmatpush3.bf16.msra.mxu1 %v1779_v24 }
 0x177   :  { %984 = vmatprep.subr.bf16.mxu0 %v1764_v9  ;;  %1568 = vmatprep.subr.bf16.mxu1 %v1780_v25 }
 0x17a   :  { %985 = vmatpush1.bf16.msra.mxu0 %v1762_v10  ;;  %1569 = vmatpush3.bf16.msra.mxu1 %v1781_v26 }
 0x17b   :  { %986 = vmatprep.subr.bf16.mxu0 %v1767_v11  ;;  %1570 = vmatprep.subr.bf16.mxu1 %v1782_v27 }
 0x17e   :  { %987 = vmatpush1.bf16.msra.mxu0 %v1765_v12  ;;  %1571 = vmatpush3.bf16.msra.mxu1 %v1783_v28 }
 0x17f   :  { %1587 = vmatprep.subr.bf16.mxu1 %v1946_v29 }
 0x181   :  { %989 = vmatmul.mubr.bf16.vlgmr.msra.gmra.mrb[4].mxu0 %v256_v58  ;;  %v1789_v58 = vld [vmem:[#allocation10 + $0xa8] sm:$0xff]  }
 0x214   :  { %v1528_v30 = vpop.f32.mrb[4].mxu1 }
 0x215   :  { %v1529_v31 = vpop.f32.mrb[5].mxu1 }
 0x216   :  { %v1530_v32 = vadd.f32 %v1529_v31, %v1528_v30  ;;  %v1531_v33 = vpop.f32.mrb[6].mxu1 }
 0x217   :  { %v1532_v34 = vpop.f32.mrb[7].mxu1 }
 0x218   :  { %v1032_v40 = vadd.f32 %v1530_v32, %v399_v36 }
 0x234   :  { %v1550_v37 = vpop.f32.mrb[8].mxu1 }
 0x235   :  { %v1551_v38 = vpop.f32.mrb[9].mxu1 }
 0x236   :  { %v1552_v41 = vadd.f32 %v1551_v38, %v1550_v37  ;;  %v1553_v42 = vpop.f32.mrb[10].mxu1 }
 0x237   :  { %v1554_v43 = vpop.f32.mrb[11].mxu1 }
 0x238   :  { %v1072_v44 = vadd.f32 %v1552_v41, %v1032_v40 }
 0x23a   :  { %v1079_v61 = vmax.f32 %v1072_v44, 0.0 }
 0x23c   :  { %v1082_v0 = vpack.c.bf16 %v1079_v61, %v1079_v61 }
 0x254   :  { %v990_v47 = vpop.f32.mrb[4].mxu0 }
 0x255   :  { %v1607_v48 = vadd.f32 %v990_v47, %v391_v45  ;;  %v992_v49 = vpop.f32.mrb[5].mxu0 }
 0x256   :  { %v1608_v50 = vadd.f32 %v992_v49, %v395_v46  ;;  %v994_v51 = vpop.f32.mrb[6].mxu0 }
 0x257   :  { %v1077_v52 = vmax.f32 %v1607_v48, 0.0  ;;  %v995_v39 = vpop.f32.mrb[7].mxu0 }
 0x258   :  { %v1078_v53 = vmax.f32 %v1608_v50, 0.0 }
 0x259   :  { %v1080_v56 = vpack.c.bf16 %v1077_v52, %v1077_v52 }
 0x25a   :  { %v1081_v54 = vpack.c.bf16 %v1078_v53, %v1078_v53 }
 0x25c   :  { %1314 = vmatprep.mubr.bf16.mxu1 %v1081_v54 }
 0x25d   :  { %1315 = vmatmul.mubr.bf16.vlgmr.msra.gmra.mrb[12].mxu1 %v1080_v56 }
 0x25e   :  { %1588 = vmatpush3.bf16.msra.mxu1 %v1784_v55  ;;  %1603 = vmatprep.mubr.msk.bf16.mxu1 %vm1947_vm1, %v1946_v29 }
 0x25f   :  { %1589 = vmatprep.subr.bf16.mxu1 %v1946_v29 }
 0x262   :  { %1590 = vmatpush3.bf16.msra.mxu1 %v1785_v57 }
 0x263   :  { %1591 = vmatprep.subr.bf16.mxu1 %v1946_v29 }
 0x266   :  { %1592 = vmatpush3.bf16.msra.mxu1 %v1786_v62 }
 0x267   :  { %1593 = vmatprep.subr.bf16.mxu1 %v1946_v29 }
 0x26a   :  { %1594 = vmatpush3.bf16.msra.mxu1 %v1787_v63 }
 0x26b   :  { %1595 = vmatprep.subr.bf16.mxu1 %v1946_v29 }
 0x26e   :  { %1596 = vmatpush3.bf16.msra.mxu1 %v1788_v1 }
 0x26f   :  { %1597 = vmatprep.subr.bf16.mxu1 %v1946_v29 }
 0x272   :  { %1598 = vmatpush3.bf16.msra.mxu1 %v1789_v58 }
 0x273   :  { %1599 = vmatprep.subr.bf16.mxu1 %v1946_v29 }
 0x276   :  { %1600 = vmatpush3.bf16.msra.mxu1 %v1790_v59 }
 0x277   :  { %1601 = vmatprep.subr.bf16.mxu1 %v1946_v29 }
 0x27a   :  { %1602 = vmatpush3.bf16.msra.mxu1 %v1791_v60 }
 0x27d   :  { %1604 = vmatmul.mubr.bf16.vlgmr.msra.gmra.mrb[16].mxu1 %v1082_v0 }
 0x330   :  { %v1572_v2 = vpop.f32.mrb[12].mxu1 }
 0x331   :  { %v1573_v3 = vpop.f32.mrb[13].mxu1 }
 0x332   :  { %v1574_v4 = vadd.f32 %v1573_v3, %v1572_v2  ;;  %v1575_v5 = vpop.f32.mrb[14].mxu1 }
 0x333   :  { %v1576_v6 = vpop.f32.mrb[15].mxu1 }
 0x334   :  { %v1317_v8 = vadd.f32 %v1574_v4, %v1487_v7 }
 0x350   :  { %v1356_v9 = vpop.f32.mrb[16].mxu1 }
 0x351   :  { %v1357_v10 = vadd.f32 %v1356_v9, %v1317_v8  ;;  %v1605_v11 = vpop.f32.mrb[17].mxu1 }
 0x352   :  { %v1359_v12 = vpop.f32.mrb[18].mxu1 }
 0x353   :  { %1792 = vtanh.f32 %v1357_v10  ;;  %v1606_v13 = vpop.f32.mrb[19].mxu1 }
 0x35d   :  { %v1793_v14 = vpop.eup %1792 }
 0x35e   :  { %1363 = vst [vmem:[#allocation11] sm:$0x3] %v1793_v14 }
 0x35f   :  { %1915 = shalt.err (!%p1912_p2)
}
 0x360   :  { %s1916_s21 = scalar_lea.hbm %s2098_s7, 32 }
 0x361   :  { %p1917_p3 = scmp.ne.s32.totalorder %s2098_s7, %s1916_s21  ;;  %p1920_p4 = scmp.lt.u32.totalorder %s1916_s21, %s2098_s7 }
 0x363   :  { %p1922_p5 = pnand %p1920_p4, %p1917_p3 }
 0x365   :  { %1925 = shalt.err (!%p1922_p5)
}
 0x366   :  { %1373 = dma.vmem_to_hbm [thread:$0]  %s1371_s18, 32, %s2098_s7, [#allocation4]  }
 0x367   :  { %1932 = dma.done.wait [#allocation4], 32  }
 0x368   :  { %1933 = vsyncadd [#allocation4], 4294967264 }
 0x369   :  { %1377 = vsyncpa [#allocation3], 1 }
 0x36a   :  { %1378 = vsyncpa [#allocation6], 1 }
 0x36b   :  { %1379 = vsyncpa [#allocation9], 1 }
 0x36c   :  { %1380 = vsyncpa [#allocation4], 1 }

</bundles_post_ra>
